<compile_context>
chip_gen: v7x
topology: tpu7x:2x2x1
jax: 0.10.0
libtpu: 0.0.40
codegen_flags: <defaults>
</compile_context>

<pallas_src>
import functools

import jax
import jax.numpy as jnp
from jax.experimental import pallas as pl
from jax.experimental.pallas import tpu as pltpu

HIDDEN = 64        # logical hidden width of the PyTorch module
HIDDEN_PAD = 128   # lane-dense padded hidden width used inside the kernel


def _policy_kernel(x_ref,
                   w1_ref, b1_ref,
                   w2_ref, b2_ref,
                   w3_ref, b3_ref,
                   w4_ref, b4_ref,
                   o_ref,
                   *, act_dtype):
    # x arrives as f32; cast to bf16 in-kernel (rides idle VALU slots).
    x = x_ref[...].astype(jnp.bfloat16)

    # Layer 1: Linear(D_in -> 128pad) + Tanh   (bf16 MXU operands, f32 accumulate)
    h = jnp.dot(x, w1_ref[...], preferred_element_type=jnp.float32)
    h = jnp.tanh(h.astype(act_dtype) + b1_ref[...].astype(act_dtype))

    # Layer 2: Linear(128pad -> 128pad) + Tanh
    h = jnp.dot(h.astype(jnp.bfloat16), w2_ref[...],
                preferred_element_type=jnp.float32)
    h = jnp.tanh(h.astype(act_dtype) + b2_ref[...].astype(act_dtype))

    # Layer 3: Linear(128pad -> 128pad) + Tanh
    h = jnp.dot(h.astype(jnp.bfloat16), w3_ref[...],
                preferred_element_type=jnp.float32)
    h = jnp.tanh(h.astype(act_dtype) + b3_ref[...].astype(act_dtype))

    # Layer 4: Linear(128pad -> 1) as VPU multiply + lane reduction (f32).
    # Avoids a transposed-RHS dot_general that could force an XLU relayout of h.
    out = jnp.sum(h.astype(jnp.float32) * w4_ref[...], axis=-1, keepdims=True)
    o_ref[...] = (out + b4_ref[...]).astype(o_ref.dtype)   # (block_b, 1)


def prepare_params(params, hidden_pad=HIDDEN_PAD):
    """Zero-pad hidden 64 -> hidden_pad; cast MXU operands to bf16.

    Zero padding is exact: padded hidden units get pre-activation 0, tanh(0)=0,
    and the corresponding rows of the next weight matrix are zero, so they
    contribute nothing downstream.
    """
    hidden = params["w1"].shape[1]
    ph = hidden_pad - hidden
    w1 = jnp.pad(params["w1"], ((0, 0), (0, ph))).astype(jnp.bfloat16)
    b1 = jnp.pad(params["b1"], ((0, 0), (0, ph))).astype(jnp.float32)
    w2 = jnp.pad(params["w2"], ((0, ph), (0, ph))).astype(jnp.bfloat16)
    b2 = jnp.pad(params["b2"], ((0, 0), (0, ph))).astype(jnp.float32)
    w3 = jnp.pad(params["w3"], ((0, ph), (0, ph))).astype(jnp.bfloat16)
    b3 = jnp.pad(params["b3"], ((0, 0), (0, ph))).astype(jnp.float32)
    # w4 used on the VPU (not MXU) -> keep f32, store as a (1, 128) row.
    w4 = jnp.pad(params["w4"], ((0, ph), (0, 0))).T.astype(jnp.float32)
    b4 = params["b4"].astype(jnp.float32)                   # (1, 1)
    return (w1, b1, w2, b2, w3, b3, w4, b4)


def _bf16_act_supported():
    """bf16 VPU/EUP exists on v6e/v7x; v5e and older need the f32 path."""
    try:
        kind = jax.devices()[0].device_kind.lower()
    except Exception:
        return False
    return not any(tag in kind for tag in ("v2", "v3", "v4", "v5"))


def _auto_block_b(batch, default=2048):
    """Large tile to amortize per-step overhead, but >= 2 grid steps when B allows
    (so v7x's second TensorCore is used)."""
    half = -(-batch // 2)                 # ceil(B / 2)
    half = -(-half // 128) * 128          # round up to a multiple of 128
    return max(128, min(default, half))


@functools.partial(jax.jit, static_argnames=("block_b", "bf16_act"))
def _policy_forward_impl(x, prepared, *, block_b, bf16_act):
    w1, b1, w2, b2, w3, b3, w4, b4 = prepared
    B, d_in = x.shape
    num_tiles = pl.cdiv(B, block_b)
    padded_b = num_tiles * block_b
    if padded_b != B:
        x = jnp.pad(x, ((0, padded_b - B), (0, 0)))   # keep f32; cast in-kernel

    act_dtype = jnp.bfloat16 if bf16_act else jnp.float32
    kernel = functools.partial(_policy_kernel, act_dtype=act_dtype)

    const = lambda i: (0, 0)  # weights/biases: VMEM-resident, DMA'd once
    out = pl.pallas_call(
        kernel,
        grid=(num_tiles,),
        in_specs=[
            pl.BlockSpec((block_b, d_in), lambda i: (i, 0)),       # x tile (f32)
            pl.BlockSpec((d_in, HIDDEN_PAD), const),               # w1
            pl.BlockSpec((1, HIDDEN_PAD), const),                  # b1
            pl.BlockSpec((HIDDEN_PAD, HIDDEN_PAD), const),         # w2
            pl.BlockSpec((1, HIDDEN_PAD), const),                  # b2
            pl.BlockSpec((HIDDEN_PAD, HIDDEN_PAD), const),         # w3
            pl.BlockSpec((1, HIDDEN_PAD), const),                  # b3
            pl.BlockSpec((1, HIDDEN_PAD), const),                  # w4 (as f32 row)
            pl.BlockSpec((1, 1), const),                           # b4
        ],
        out_specs=pl.BlockSpec((block_b, 1), lambda i: (i, 0)),
        out_shape=jax.ShapeDtypeStruct((padded_b, 1), jnp.float32),
        compiler_params=pltpu.CompilerParams(
            dimension_semantics=("parallel",),
            vmem_limit_bytes=48 * 1024 * 1024),
    )(x, w1, b1, w2, b2, w3, b3, w4, b4)

    return out[:B]   # drop padded tail rows -> (B, 1)


def policy_forward(x, prepared, *, block_b=None, bf16_act=None):
    """x: (B, D_in) float32.  prepared: output of prepare_params()."""
    if block_b is None:
        block_b = _auto_block_b(x.shape[0])
    if bf16_act is None:
        bf16_act = _bf16_act_supported()
    return _policy_forward_impl(x, prepared, block_b=block_b, bf16_act=bf16_act)


def init_params(key, d_in, hidden=HIDDEN, d_out=1):
    """PyTorch nn.Linear-style init: U[-1/sqrt(fan_in), 1/sqrt(fan_in)].
    Weights stored (in, out); biases stored (1, out)."""
    dims = [(d_in, hidden), (hidden, hidden), (hidden, hidden), (hidden, d_out)]
    params = {}
    for i, (fan_in, fan_out) in enumerate(dims, start=1):
        key, kw, kb = jax.random.split(key, 3)
        bound = 1.0 / jnp.sqrt(jnp.float32(fan_in))
        params[f"w{i}"] = jax.random.uniform(
            kw, (fan_in, fan_out), jnp.float32, minval=-bound, maxval=bound)
        params[f"b{i}"] = jax.random.uniform(
            kb, (1, fan_out), jnp.float32, minval=-bound, maxval=bound)
    return params


def _reference_forward(x, p):
    h = jnp.tanh(x @ p["w1"] + p["b1"])
    h = jnp.tanh(h @ p["w2"] + p["b2"])
    h = jnp.tanh(h @ p["w3"] + p["b3"])
    return h @ p["w4"] + p["b4"]


if __name__ == "__main__":
    key = jax.random.PRNGKey(0)
    key, kx, kp = jax.random.split(key, 3)

    B, D_IN = 300, 32  # small; auto block_b=256 -> 2 grid steps + padded tail
    x = jax.random.normal(kx, (B, D_IN), jnp.float32)
    params = init_params(kp, D_IN)
    prepared = prepare_params(params)

    out = policy_forward(x, prepared)
    out = jax.block_until_ready(out)

    # Sanity check against the pure-f32 JAX reference (loose tolerance because
    # the kernel uses bf16 matmul operands and, on v6e/v7x, bf16 tanh).
    ref = _reference_forward(x, params)
    assert out.shape == (B, 1)
    assert jnp.allclose(out, ref, atol=5e-2, rtol=5e-2), float(
        jnp.max(jnp.abs(out - ref)))

    print("KERNEL_OK")
</pallas_src>

<mosaic_0001>
module attributes {stable_mosaic.version = 11 : i64} {
  func.func @_policy_kernel(%arg0: i32, %arg1: memref<256x32xf32, #tpu.memory_space<vmem>>, %arg2: memref<32x128xbf16, #tpu.memory_space<vmem>>, %arg3: memref<1x128xf32, #tpu.memory_space<vmem>>, %arg4: memref<128x128xbf16, #tpu.memory_space<vmem>>, %arg5: memref<1x128xf32, #tpu.memory_space<vmem>>, %arg6: memref<128x128xbf16, #tpu.memory_space<vmem>>, %arg7: memref<1x128xf32, #tpu.memory_space<vmem>>, %arg8: memref<1x128xf32, #tpu.memory_space<vmem>>, %arg9: memref<1x1xf32, #tpu.memory_space<vmem>>, %arg10: memref<256x1xf32, #tpu.memory_space<vmem>>) attributes {dimension_semantics = [#tpu.dimension_semantics<parallel>], iteration_bounds = array<i64: 2>, scalar_prefetch = 0 : i64, scratch_operands = 0 : i64, tpu.core_type = #tpu.core_type<tc>, window_params = [{transform_indices = @transform_0, window_bounds = array<i64: 256, 32>}, {pipeline_mode = #tpu.pipeline_mode<synchronous>, transform_indices = @transform_1, window_bounds = array<i64: 32, 128>}, {pipeline_mode = #tpu.pipeline_mode<synchronous>, transform_indices = @transform_2, window_bounds = array<i64: 1, 128>}, {pipeline_mode = #tpu.pipeline_mode<synchronous>, transform_indices = @transform_3, window_bounds = array<i64: 128, 128>}, {pipeline_mode = #tpu.pipeline_mode<synchronous>, transform_indices = @transform_4, window_bounds = array<i64: 1, 128>}, {pipeline_mode = #tpu.pipeline_mode<synchronous>, transform_indices = @transform_5, window_bounds = array<i64: 128, 128>}, {pipeline_mode = #tpu.pipeline_mode<synchronous>, transform_indices = @transform_6, window_bounds = array<i64: 1, 128>}, {pipeline_mode = #tpu.pipeline_mode<synchronous>, transform_indices = @transform_7, window_bounds = array<i64: 1, 128>}, {pipeline_mode = #tpu.pipeline_mode<synchronous>, transform_indices = @transform_8, window_bounds = array<i64: 1, 1>}, {transform_indices = @transform_9, window_bounds = array<i64: 256, 1>}]} {
    %c0 = arith.constant 0 : index
    %c0_0 = arith.constant 0 : index
    %0 = vector.load %arg1[%c0, %c0_0] : memref<256x32xf32, #tpu.memory_space<vmem>>, vector<256x32xf32>
    %1 = arith.truncf %0 : vector<256x32xf32> to vector<256x32xbf16>
    %c0_1 = arith.constant 0 : index
    %c0_2 = arith.constant 0 : index
    %2 = vector.load %arg2[%c0_1, %c0_2] : memref<32x128xbf16, #tpu.memory_space<vmem>>, vector<32x128xbf16>
    %cst = arith.constant dense<0.000000e+00> : vector<256x128xf32>
    %3 = tpu.matmul %1, %2, %cst {dimension_numbers = #tpu.dot_dimension_numbers<[1], [0], [0], [1], [0, 0, 1, 1], [], []>} : vector<256x32xbf16>, vector<32x128xbf16>, vector<256x128xf32> -> vector<256x128xf32>
    %4 = arith.truncf %3 : vector<256x128xf32> to vector<256x128xbf16>
    %c0_3 = arith.constant 0 : index
    %c0_4 = arith.constant 0 : index
    %5 = vector.load %arg3[%c0_3, %c0_4] : memref<1x128xf32, #tpu.memory_space<vmem>>, vector<1x128xf32>
    %6 = arith.truncf %5 : vector<1x128xf32> to vector<1x128xbf16>
    %7 = vector.broadcast %6 : vector<1x128xbf16> to vector<256x128xbf16>
    %8 = arith.addf %4, %7 : vector<256x128xbf16>
    %9 = math.tanh %8 : vector<256x128xbf16>
    %c0_5 = arith.constant 0 : index
    %c0_6 = arith.constant 0 : index
    %10 = vector.load %arg4[%c0_5, %c0_6] : memref<128x128xbf16, #tpu.memory_space<vmem>>, vector<128x128xbf16>
    %cst_7 = arith.constant dense<0.000000e+00> : vector<256x128xf32>
    %11 = tpu.matmul %9, %10, %cst_7 {dimension_numbers = #tpu.dot_dimension_numbers<[1], [0], [0], [1], [0, 0, 1, 1], [], []>} : vector<256x128xbf16>, vector<128x128xbf16>, vector<256x128xf32> -> vector<256x128xf32>
    %12 = arith.truncf %11 : vector<256x128xf32> to vector<256x128xbf16>
    %c0_8 = arith.constant 0 : index
    %c0_9 = arith.constant 0 : index
    %13 = vector.load %arg5[%c0_8, %c0_9] : memref<1x128xf32, #tpu.memory_space<vmem>>, vector<1x128xf32>
    %14 = arith.truncf %13 : vector<1x128xf32> to vector<1x128xbf16>
    %15 = vector.broadcast %14 : vector<1x128xbf16> to vector<256x128xbf16>
    %16 = arith.addf %12, %15 : vector<256x128xbf16>
    %17 = math.tanh %16 : vector<256x128xbf16>
    %c0_10 = arith.constant 0 : index
    %c0_11 = arith.constant 0 : index
    %18 = vector.load %arg6[%c0_10, %c0_11] : memref<128x128xbf16, #tpu.memory_space<vmem>>, vector<128x128xbf16>
    %cst_12 = arith.constant dense<0.000000e+00> : vector<256x128xf32>
    %19 = tpu.matmul %17, %18, %cst_12 {dimension_numbers = #tpu.dot_dimension_numbers<[1], [0], [0], [1], [0, 0, 1, 1], [], []>} : vector<256x128xbf16>, vector<128x128xbf16>, vector<256x128xf32> -> vector<256x128xf32>
    %20 = arith.truncf %19 : vector<256x128xf32> to vector<256x128xbf16>
    %c0_13 = arith.constant 0 : index
    %c0_14 = arith.constant 0 : index
    %21 = vector.load %arg7[%c0_13, %c0_14] : memref<1x128xf32, #tpu.memory_space<vmem>>, vector<1x128xf32>
    %22 = arith.truncf %21 : vector<1x128xf32> to vector<1x128xbf16>
    %23 = vector.broadcast %22 : vector<1x128xbf16> to vector<256x128xbf16>
    %24 = arith.addf %20, %23 : vector<256x128xbf16>
    %25 = math.tanh %24 : vector<256x128xbf16>
    %26 = arith.extf %25 : vector<256x128xbf16> to vector<256x128xf32>
    %c0_15 = arith.constant 0 : index
    %c0_16 = arith.constant 0 : index
    %27 = vector.load %arg8[%c0_15, %c0_16] : memref<1x128xf32, #tpu.memory_space<vmem>>, vector<1x128xf32>
    %28 = vector.broadcast %27 : vector<1x128xf32> to vector<256x128xf32>
    %29 = arith.mulf %26, %28 : vector<256x128xf32>
    %cst_17 = arith.constant dense<0.000000e+00> : vector<256xf32>
    %30 = vector.multi_reduction <add>, %29, %cst_17 [1] : vector<256x128xf32> to vector<256xf32>
    %31 = vector.shape_cast %30 : vector<256xf32> to vector<256x1xf32>
    %c0_18 = arith.constant 0 : index
    %c0_19 = arith.constant 0 : index
    %32 = vector.load %arg9[%c0_18, %c0_19] : memref<1x1xf32, #tpu.memory_space<vmem>>, vector<1x1xf32>
    %33 = vector.broadcast %32 : vector<1x1xf32> to vector<256x1xf32>
    %34 = arith.addf %31, %33 : vector<256x1xf32>
    %c0_20 = arith.constant 0 : index
    %c0_21 = arith.constant 0 : index
    %35 = vector.load %arg10[%c0_20, %c0_21] : memref<256x1xf32, #tpu.memory_space<vmem>>, vector<256x1xf32>
    tpu.vector_store %arg10[%c0_20, %c0_21], %34 {strides = array<i32>} : memref<256x1xf32, #tpu.memory_space<vmem>>, vector<256x1xf32>,
    return
  }
  func.func @transform_0(%arg0: i32) -> (i32, i32) {
    %c0_i32 = arith.constant 0 : i32
    %c0_i32_0 = arith.constant 0 : i32
    return %arg0, %c0_i32 : i32, i32
  }
  func.func @transform_1(%arg0: i32) -> (i32, i32) {
    %c0_i32 = arith.constant 0 : i32
    %c0_i32_0 = arith.constant 0 : i32
    %c0_i32_1 = arith.constant 0 : i32
    return %c0_i32, %c0_i32_0 : i32, i32
  }
  func.func @transform_2(%arg0: i32) -> (i32, i32) {
    %c0_i32 = arith.constant 0 : i32
    %c0_i32_0 = arith.constant 0 : i32
    %c0_i32_1 = arith.constant 0 : i32
    return %c0_i32, %c0_i32_0 : i32, i32
  }
  func.func @transform_3(%arg0: i32) -> (i32, i32) {
    %c0_i32 = arith.constant 0 : i32
    %c0_i32_0 = arith.constant 0 : i32
    %c0_i32_1 = arith.constant 0 : i32
    return %c0_i32, %c0_i32_0 : i32, i32
  }
  func.func @transform_4(%arg0: i32) -> (i32, i32) {
    %c0_i32 = arith.constant 0 : i32
    %c0_i32_0 = arith.constant 0 : i32
    %c0_i32_1 = arith.constant 0 : i32
    return %c0_i32, %c0_i32_0 : i32, i32
  }
  func.func @transform_5(%arg0: i32) -> (i32, i32) {
    %c0_i32 = arith.constant 0 : i32
    %c0_i32_0 = arith.constant 0 : i32
    %c0_i32_1 = arith.constant 0 : i32
    return %c0_i32, %c0_i32_0 : i32, i32
  }
  func.func @transform_6(%arg0: i32) -> (i32, i32) {
    %c0_i32 = arith.constant 0 : i32
    %c0_i32_0 = arith.constant 0 : i32
    %c0_i32_1 = arith.constant 0 : i32
    return %c0_i32, %c0_i32_0 : i32, i32
  }
  func.func @transform_7(%arg0: i32) -> (i32, i32) {
    %c0_i32 = arith.constant 0 : i32
    %c0_i32_0 = arith.constant 0 : i32
    %c0_i32_1 = arith.constant 0 : i32
    return %c0_i32, %c0_i32_0 : i32, i32
  }
  func.func @transform_8(%arg0: i32) -> (i32, i32) {
    %c0_i32 = arith.constant 0 : i32
    %c0_i32_0 = arith.constant 0 : i32
    %c0_i32_1 = arith.constant 0 : i32
    return %c0_i32, %c0_i32_0 : i32, i32
  }
  func.func @transform_9(%arg0: i32) -> (i32, i32) {
    %c0_i32 = arith.constant 0 : i32
    %c0_i32_0 = arith.constant 0 : i32
    return %arg0, %c0_i32 : i32, i32
  }
}

</mosaic_0001>

<bundles_post_ra>
// kernel: _policy_forward_impl.1
= control target key start
LH: loop header
LB: loop body
LE: loop exit
PB: predicated region body
PF: predicated region fallthrough
CT: control target
= control target key end

     0   :  { %s1929_s11 = smov 0   ;;  %s2274_s0 = inlined_call_operand.vmem [shape: f32[512,32], index: 0, kind: input, shape index: {}]   ;;  %s2275_s1 = inlined_call_operand.vmem [shape: bf16[32,128], index: 1, kind: input, shape index: {}]   ;;  %s2276_s2 = inlined_call_operand.vmem [shape: f32[1,128], index: 2, kind: input, shape index: {}]   ;;  %s2277_s3 = inlined_call_operand.vmem [shape: bf16[128,128], index: 3, kind: input, shape index: {}]   ;;  %s2278_s4 = inlined_call_operand.vmem [shape: f32[1,128], index: 4, kind: input, shape index: {}]   ;;  %s2279_s5 = inlined_call_operand.vmem [shape: bf16[128,128], index: 5, kind: input, shape index: {}]   ;;  %s2280_s6 = inlined_call_operand.vmem [shape: f32[1,128], index: 6, kind: input, shape index: {}]   ;;  %s2281_s7 = inlined_call_operand.vmem [shape: f32[1,128], index: 7, kind: input, shape index: {}]   ;;  %s2282_s8 = inlined_call_operand.<no memory space> [shape: f32[1,1], index: 8, kind: input, shape index: {}]   ;;  %s2283_s9 = inlined_call_operand.vmem [shape: f32[512,1], index: 9, kind: output, shape index: {}]  }
   0x1   :  { %v14_v0 = vstv %s2282_s8 }
   0x2   :  { %15 = vst [vmem:[#allocation2] sm:$0x1] %v14_v0 }
   0x3 LB: > { %s1497_s12 = sadd.s32 4294967295, %s1874_s11   ;;  %p1501_p0 = scmp.ge.s32.totalorder %s1874_s11, 1  ;;  %s1874_s11 = sphi %s1929_s11, %s21_s11  }
   0x4   : > { %p290_p1 = scmp.lt.s32.totalorder %s1874_s11, 3 }
   0x6   : > { %p291_p2 = pnand %p1501_p0, %p290_p1 }
   0x7   : > { %v1754_v1 = vld [vmem:[%s2275_s1] sm:$0xff] (!%p291_p2)   ;;  %s1502_s8 = sshll.u32 (!%p291_p2), %s1497_s12, 5  ;;  %v1755_v2 = vld [vmem:[%s2275_s1 + $0x8] sm:$0xff] (!%p291_p2)   ;;  %vm403_vm0 = vcmask (!%p291_p2), 261120   ;;  %v1758_v31 = vld [vmem:[%s2277_s3 + $0x10] sm:$0xff] (!%p291_p2)   ;;  %v634_v62 = vlaneseq (!%p291_p2)  ;;  %vm1408_vm1 = vcmask (!%p291_p2), 7168  }
   0x8   : > { %294 = sbr.rel (%p291_p2) target bundleno = 926 (0x39e), region = 56  ;;  %p327_p3 = scmp.lt.s32.totalorder (!%p291_p2), %s1502_s8, 63  ;;  %1610 = vmatprep.subr.bf16.mxu0 (!%p291_p2), %v1754_v1  ;;  %1742 = vmatprep.subr.bf16.mxu1 (!%p291_p2), %v1754_v1  ;;  %v1756_v3 = vld [vmem:[%s2277_s3] sm:$0xff] (!%p291_p2)   ;;  %v1757_v25 = vld [vmem:[%s2277_s3 + $0x8] sm:$0xff] (!%p291_p2)   ;;  %v1759_v54 = vld [vmem:[%s2277_s3 + $0x18] sm:$0xff] (!%p291_p2)  }
   0x9   : > { %1611 = vmatpush3.bf16.msra.mxu0 (!%p291_p2), %v1754_v1  ;;  %1744 = vmatpush3.bf16.msra.mxu1 (!%p291_p2), %v1754_v1  ;;  %v1760_v55 = vld [vmem:[%s2277_s3 + $0x20] sm:$0xff] (!%p291_p2)   ;;  %v1761_v56 = vld [vmem:[%s2277_s3 + $0x28] sm:$0xff] (!%p291_p2)   ;;  %v1762_v57 = vld [vmem:[%s2277_s3 + $0x30] sm:$0xff] (!%p291_p2)   ;;  %v635_v1 = vshrl.u32 (!%p291_p2), %v634_v62, 7 }
   0xa   : > { %1612 = vmatprep.subr.bf16.mxu0 (!%p291_p2), %v1755_v2  ;;  %1743 = vmatprep.subr.bf16.mxu1 (!%p291_p2), %v1755_v2  ;;  %v1763_v58 = vld [vmem:[%s2277_s3 + $0x38] sm:$0xff] (!%p291_p2)   ;;  %v1764_v59 = vld [vmem:[%s2279_s5] sm:$0xff] (!%p291_p2)   ;;  %v1765_v60 = vld [vmem:[%s2279_s5 + $0x8] sm:$0xff] (!%p291_p2)  }
   0xb   : > { %v1766_v61 = vld [vmem:[%s2279_s5 + $0x10] sm:$0xff] (!%p291_p2)   ;;  %v629_v63 = vld [vmem:[%s2276_s2] sm:$0x1] (!%p291_p2) }
   0xc   : > { %v630_v0 = vpack.c.bf16 (!%p291_p2), %v629_v63, %v629_v63 }
   0xd   : > { %1613 = vmatpush3.bf16.msra.mxu0 (!%p291_p2), %v1755_v2  ;;  %1745 = vmatpush3.bf16.msra.mxu1 (!%p291_p2), %v1755_v2 }
   0xe   : > { %1646 = vmatprep.subr.bf16.mxu1 (!%p291_p2), %v1756_v3  ;;  %1694 = vmatprep.subr.bf16.mxu0 (!%p291_p2), %v1764_v59  ;;  %v632_v2 = vpack.i.b16 (!%p291_p2), %v630_v0, %v630_v0 }
   0xf   : > { %s2285_s8 = smov (!%p327_p3, %s1502_s8), 63 }
  0x10   : > { %s1503_s19 = sshll.u32 %s2285_s8, 3 }
  0x11   : > { %s1954_s22 = scalar_lea.vmem %s2274_s0, %s1503_s19  ;;  %s2173_s25 = scalar_lea.vmem %s2283_s9, %s1503_s19 }
  0x12   : > { %v339_v4 = vld [vmem:[%s1954_s22] sm:$0xff]  ;;  %v340_v5 = vld [vmem:[%s1954_s22 + $0x8] sm:$0xff]  ;;  %v341_v6 = vld [vmem:[%s1954_s22 + $0x10] sm:$0xff] }
  0x13   : > { %v371_v7 = vpack.c.bf16 %v340_v5, %v339_v4  ;;  %v342_v8 = vld [vmem:[%s1954_s22 + $0x18] sm:$0xff]  ;;  %v343_v9 = vld [vmem:[%s1954_s22 + $0x20] sm:$0xff]  ;;  %v344_v10 = vld [vmem:[%s1954_s22 + $0x28] sm:$0xff] }
  0x14   : > { %v372_v11 = vpack.c.bf16 %v342_v8, %v341_v6  ;;  %v373_v12 = vpack.c.bf16 %v344_v10, %v343_v9  ;;  %v345_v13 = vld [vmem:[%s1954_s22 + $0x30] sm:$0xff]  ;;  %v346_v14 = vld [vmem:[%s1954_s22 + $0x38] sm:$0xff]  ;;  %v347_v15 = vld [vmem:[%s1954_s22 + $0x40] sm:$0xff] }
  0x15   : > { %1614 = vmatprep.mubr.msk.bf16.mxu0 %vm403_vm0, %v371_v7  ;;  %v348_v16 = vld [vmem:[%s1954_s22 + $0x48] sm:$0xff]  ;;  %v355_v17 = vld [vmem:[%s1954_s22 + $0x80] sm:$0xff]  ;;  %v357_v20 = vld [vmem:[%s1954_s22 + $0x90] sm:$0xff]  ;;  %v374_v26 = vpack.c.bf16 %v346_v14, %v345_v13 }
  0x16   : > { %1615 = vmatmul.mubr.msk.bf16.vlgmr.msra.gmra.mrb[0].mxu0 %vm403_vm0, %v372_v11  ;;  %v356_v18 = vld [vmem:[%s1954_s22 + $0x88] sm:$0xff]  ;;  %v358_v21 = vld [vmem:[%s1954_s22 + $0x98] sm:$0xff]  ;;  %v359_v22 = vld [vmem:[%s1954_s22 + $0xa0] sm:$0xff]  ;;  %v375_v28 = vpack.c.bf16 %v348_v16, %v347_v15 }
  0x17   : > { %1618 = vmatprep.mubr.msk.bf16.mxu0 %vm403_vm0, %v373_v12  ;;  %v379_v19 = vpack.c.bf16 %v356_v18, %v355_v17  ;;  %v380_v23 = vpack.c.bf16 %v358_v21, %v357_v20  ;;  %v360_v24 = vld [vmem:[%s1954_s22 + $0xa8] sm:$0xff]  ;;  %v361_v29 = vld [vmem:[%s1954_s22 + $0xb0] sm:$0xff]  ;;  %v362_v30 = vld [vmem:[%s1954_s22 + $0xb8] sm:$0xff]  ;;  %1695 = vmatpush3.bf16.msra.mxu0 %v1764_v59 }
  0x18   : > { %v381_v27 = vpack.c.bf16 %v360_v24, %v359_v22  ;;  %v363_v32 = vld [vmem:[%s1954_s22 + $0xc0] sm:$0xff]  ;;  %v364_v33 = vld [vmem:[%s1954_s22 + $0xc8] sm:$0xff]  ;;  %v349_v34 = vld [vmem:[%s1954_s22 + $0x50] sm:$0xff]  ;;  %v382_v38 = vpack.c.bf16 %v362_v30, %v361_v29  ;;  %1696 = vmatprep.subr.bf16.mxu0 %v1765_v60 }
  0x19   : > { %1630 = vmatprep.mubr.msk.bf16.mxu1 %vm403_vm0, %v379_v19  ;;  %v350_v35 = vld [vmem:[%s1954_s22 + $0x58] sm:$0xff]  ;;  %v351_v36 = vld [vmem:[%s1954_s22 + $0x60] sm:$0xff]  ;;  %v352_v37 = vld [vmem:[%s1954_s22 + $0x68] sm:$0xff]  ;;  %v383_v39 = vpack.c.bf16 %v364_v33, %v363_v32 }
  0x1a   : > { %1631 = vmatmul.mubr.msk.bf16.vlgmr.msra.gmra.mrb[0].mxu1 %vm403_vm0, %v380_v23  ;;  %v376_v40 = vpack.c.bf16 %v350_v35, %v349_v34  ;;  %v377_v41 = vpack.c.bf16 %v352_v37, %v351_v36  ;;  %v365_v42 = vld [vmem:[%s1954_s22 + $0xd0] sm:$0xff]  ;;  %v366_v43 = vld [vmem:[%s1954_s22 + $0xd8] sm:$0xff]  ;;  %v367_v44 = vld [vmem:[%s1954_s22 + $0xe0] sm:$0xff] }
  0x1b   : > { %1634 = vmatprep.mubr.msk.bf16.mxu1 %vm403_vm0, %v381_v27  ;;  %1647 = vmatpush3.bf16.msra.mxu1 %v1756_v3  ;;  %v368_v45 = vld [vmem:[%s1954_s22 + $0xe8] sm:$0xff]  ;;  %v353_v46 = vld [vmem:[%s1954_s22 + $0x70] sm:$0xff]  ;;  %v354_v47 = vld [vmem:[%s1954_s22 + $0x78] sm:$0xff]  ;;  %v384_v48 = vpack.c.bf16 %v366_v43, %v365_v42  ;;  %v2037_v3 = vsub.s32 0, %v635_v1 }
  0x1c   : > { %1648 = vmatprep.subr.bf16.mxu1 %v1757_v25  ;;  %v385_v49 = vpack.c.bf16 %v368_v45, %v367_v44  ;;  %v378_v50 = vpack.c.bf16 %v354_v47, %v353_v46  ;;  %v369_v51 = vld [vmem:[%s1954_s22 + $0xf0] sm:$0xff]  ;;  %v370_v52 = vld [vmem:[%s1954_s22 + $0xf8] sm:$0xff]  ;;  %1697 = vmatpush3.bf16.msra.mxu0 %v1765_v60 }
  0x1d   : > { %v386_v53 = vpack.c.bf16 %v370_v52, %v369_v51  ;;  %1698 = vmatprep.subr.bf16.mxu0 %v1766_v61  ;;  %v2040_v6 = vrot.slane %v632_v2, %v2037_v3 }
  0x1e   : > { %1619 = vmatmul.mubr.msk.bf16.gmra.mrb[4].mxu0 %vm403_vm0, %v374_v26 }
  0x1f   : > { %1622 = vmatprep.mubr.msk.bf16.mxu0 %vm403_vm0, %v375_v28  ;;  %1649 = vmatpush3.bf16.msra.mxu1 %v1757_v25 }
  0x20   : > { %1650 = vmatprep.subr.bf16.mxu1 %v1758_v31  ;;  %1699 = vmatpush3.bf16.msra.mxu0 %v1766_v61 }
  0x22   : > { %1635 = vmatmul.mubr.msk.bf16.gmra.mrb[4].mxu1 %vm403_vm0, %v382_v38 }
  0x23   : > { %1638 = vmatprep.mubr.msk.bf16.mxu1 %vm403_vm0, %v383_v39  ;;  %1651 = vmatpush3.bf16.msra.mxu1 %v1758_v31 }
  0x24   : > { %1652 = vmatprep.subr.bf16.mxu1 %v1759_v54 }
  0x26   : > { %1623 = vmatmul.mubr.msk.bf16.gmra.mrb[8].mxu0 %vm403_vm0, %v376_v40 }
  0x27   : > { %1626 = vmatprep.mubr.msk.bf16.mxu0 %vm403_vm0, %v377_v41  ;;  %1653 = vmatpush3.bf16.msra.mxu1 %v1759_v54 }
  0x28   : > { %1654 = vmatprep.subr.bf16.mxu1 %v1760_v55 }
  0x2a   : > { %1639 = vmatmul.mubr.msk.bf16.gmra.mrb[8].mxu1 %vm403_vm0, %v384_v48 }
  0x2b   : > { %1642 = vmatprep.mubr.msk.bf16.mxu1 %vm403_vm0, %v385_v49  ;;  %1655 = vmatpush3.bf16.msra.mxu1 %v1760_v55 }
  0x2c   : > { %1656 = vmatprep.subr.bf16.mxu1 %v1761_v56 }
  0x2e   : > { %1627 = vmatmul.mubr.msk.bf16.gmra.mrb[12].mxu0 %vm403_vm0, %v378_v50 }
  0x2f   : > { %1657 = vmatpush3.bf16.msra.mxu1 %v1761_v56 }
  0x30   : > { %1658 = vmatprep.subr.bf16.mxu1 %v1762_v57 }
  0x32   : > { %1643 = vmatmul.mubr.msk.bf16.gmra.mrb[12].mxu1 %vm403_vm0, %v386_v53 }
  0x33   : > { %1659 = vmatpush3.bf16.msra.mxu1 %v1762_v57 }
  0x34   : > { %1660 = vmatprep.subr.bf16.mxu1 %v1763_v58 }
  0x37   : > { %1661 = vmatpush3.bf16.msra.mxu1 %v1763_v58 }
  0xe9   : > { %v1616_v4 = vpop.f32.mrb[0].mxu0 }
  0xea   : > { %v486_v5 = vpop.f32.mrb[1].mxu0 }
  0xeb   : > { %v1617_v7 = vpop.f32.mrb[2].mxu0 }
  0xec   : > { %v614_v8 = vpack.c.bf16 %v1617_v7, %v1616_v4  ;;  %v489_v9 = vpop.f32.mrb[3].mxu0 }
  0xed   : > { %v613_v10 = vpack.c.bf16 %v489_v9, %v486_v5  ;;  %v2043_v12 = vpop.f32.mrb[0].mxu1 }
  0xee   : > { %v639_v11 = vadd.bf16 %v2040_v6, %v614_v8  ;;  %v550_v14 = vpop.f32.mrb[1].mxu1 }
  0xef   : > { %v638_v13 = vadd.bf16 %v2040_v6, %v613_v10  ;;  %v2046_v15 = vpop.f32.mrb[2].mxu1 }
  0xf0   : > { %v622_v17 = vpack.c.bf16 %v2046_v15, %v2043_v12  ;;  %v553_v18 = vpop.f32.mrb[3].mxu1 }
  0xf1   : > { %1772 = vtanh.bf16 %v638_v13  ;;  %v1620_v16 = vpop.f32.mrb[4].mxu0  ;;  %v621_v20 = vpack.c.bf16 %v553_v18, %v550_v14 }
  0xf2   : > { %1774 = vtanh.bf16 %v639_v11  ;;  %v502_v19 = vpop.f32.mrb[5].mxu0  ;;  %v647_v7 = vadd.bf16 %v2040_v6, %v622_v17 }
  0xf3   : > { %v1621_v21 = vpop.f32.mrb[6].mxu0  ;;  %v646_v55 = vadd.bf16 %v2040_v6, %v621_v20 }
  0xf4   : > { %v616_v22 = vpack.c.bf16 %v1621_v21, %v1620_v16  ;;  %v505_v23 = vpop.f32.mrb[7].mxu0 }
  0xf5   : > { %v615_v24 = vpack.c.bf16 %v505_v23, %v502_v19  ;;  %v2051_v26 = vpop.f32.mrb[4].mxu1  ;;  %v1767_v23 = vld [vmem:[%s2279_s5 + $0x18] sm:$0xff]  }
  0xf6   : > { %v641_v25 = vadd.bf16 %v2040_v6, %v616_v22  ;;  %v566_v28 = vpop.f32.mrb[5].mxu1  ;;  %1700 = vmatprep.subr.bf16.mxu0 %v1767_v23 }
  0xf7   : > { %v640_v27 = vadd.bf16 %v2040_v6, %v615_v24  ;;  %v1637_v29 = vpop.f32.mrb[6].mxu1  ;;  %1701 = vmatpush3.bf16.msra.mxu0 %v1767_v23  ;;  %v1768_v24 = vld [vmem:[%s2279_s5 + $0x20] sm:$0xff]  }
  0xf8   : > { %v624_v31 = vpack.c.bf16 %v1637_v29, %v2051_v26  ;;  %v569_v32 = vpop.f32.mrb[7].mxu1  ;;  %1702 = vmatprep.subr.bf16.mxu0 %v1768_v24  ;;  %v1771_v26 = vld [vmem:[%s2279_s5 + $0x38] sm:$0xff]  }
  0xf9   : > { %1776 = vtanh.bf16 %v640_v27  ;;  %v1624_v30 = vpop.f32.mrb[8].mxu0  ;;  %v623_v34 = vpack.c.bf16 %v569_v32, %v566_v28  ;;  %v911_v27 = vld [vmem:[%s2278_s4] sm:$0x1] }
  0xfa   : > { %1778 = vtanh.bf16 %v641_v25  ;;  %v518_v33 = vpop.f32.mrb[9].mxu0  ;;  %v649_v13 = vadd.bf16 %v2040_v6, %v624_v31  ;;  %v1770_v25 = vld [vmem:[%s2279_s5 + $0x30] sm:$0xff]   ;;  %v912_v28 = vpack.c.bf16 %v911_v27, %v911_v27 }
  0xfb   : > { %v1625_v35 = vpop.f32.mrb[10].mxu0  ;;  %v648_v5 = vadd.bf16 %v2040_v6, %v623_v34  ;;  %1703 = vmatpush3.bf16.msra.mxu0 %v1768_v24 }
  0xfc   : > { %v1773_v36 = vpop.eup %1772  ;;  %v618_v37 = vpack.c.bf16 %v1625_v35, %v1624_v30  ;;  %v521_v38 = vpop.f32.mrb[11].mxu0  ;;  %v914_v29 = vpack.i.b16 %v912_v28, %v912_v28 }
  0xfd   : > { %v1775_v39 = vpop.eup %1774  ;;  %v617_v40 = vpack.c.bf16 %v521_v38, %v518_v33  ;;  %1662 = vmatprep.mubr.bf16.mxu1 %v1773_v36  ;;  %v1640_v42 = vpop.f32.mrb[8].mxu1 }
  0xfe   : > { %v643_v41 = vadd.bf16 %v2040_v6, %v618_v37  ;;  %1663 = vmatmul.mubr.bf16.vlgmr.msra.gmra.mrb[16].mxu1 %v1775_v39  ;;  %v582_v44 = vpop.f32.mrb[9].mxu1  ;;  %v2089_v32 = vrot.slane %v914_v29, %v2037_v3 }
  0xff   : > { %v642_v43 = vadd.bf16 %v2040_v6, %v617_v40  ;;  %v1641_v45 = vpop.f32.mrb[10].mxu1 }
 0x100   : > { %v626_v47 = vpack.c.bf16 %v1641_v45, %v1640_v42  ;;  %v585_v48 = vpop.f32.mrb[11].mxu1 }
 0x101   : > { %1780 = vtanh.bf16 %v642_v43  ;;  %v1628_v46 = vpop.f32.mrb[12].mxu0  ;;  %v625_v50 = vpack.c.bf16 %v585_v48, %v582_v44 }
 0x102   : > { %1782 = vtanh.bf16 %v643_v41  ;;  %v534_v49 = vpop.f32.mrb[13].mxu0  ;;  %v651_v15 = vadd.bf16 %v2040_v6, %v626_v47 }
 0x103   : > { %v1629_v51 = vpop.f32.mrb[14].mxu0  ;;  %1784 = vtanh.bf16 %v646_v55  ;;  %v650_v11 = vadd.bf16 %v2040_v6, %v625_v50 }
 0x104   : > { %v1777_v52 = vpop.eup %1776  ;;  %v620_v53 = vpack.c.bf16 %v1629_v51, %v1628_v46  ;;  %v537_v54 = vpop.f32.mrb[15].mxu0 }
 0x105   : > { %v1779_v56 = vpop.eup %1778  ;;  %v619_v57 = vpack.c.bf16 %v537_v54, %v534_v49  ;;  %1666 = vmatprep.mubr.bf16.mxu1 %v1777_v52  ;;  %v1644_v59 = vpop.f32.mrb[12].mxu1 }
 0x106   : > { %v645_v58 = vadd.bf16 %v2040_v6, %v620_v53  ;;  %1667 = vmatmul.mubr.bf16.gmra.mrb[20].mxu1 %v1779_v56  ;;  %v598_v61 = vpop.f32.mrb[13].mxu1 }
 0x107   : > { %v644_v60 = vadd.bf16 %v2040_v6, %v619_v57  ;;  %v1645_v62 = vpop.f32.mrb[14].mxu1 }
 0x108   : > { %v628_v63 = vpack.c.bf16 %v1645_v62, %v1644_v59  ;;  %v601_v0 = vpop.f32.mrb[15].mxu1 }
 0x109   : > { %1786 = vtanh.bf16 %v644_v60  ;;  %v627_v1 = vpack.c.bf16 %v601_v0, %v598_v61 }
 0x10a   : > { %1788 = vtanh.bf16 %v645_v58  ;;  %v653_v19 = vadd.bf16 %v2040_v6, %v628_v63 }
 0x10b   : > { %1790 = vtanh.bf16 %v648_v5  ;;  %v652_v12 = vadd.bf16 %v2040_v6, %v627_v1  ;;  %v1769_v6 = vld [vmem:[%s2279_s5 + $0x28] sm:$0xff]  }
 0x10c   : > { %v1781_v2 = vpop.eup %1780  ;;  %1792 = vtanh.bf16 %v647_v7  ;;  %1704 = vmatprep.subr.bf16.mxu0 %v1769_v6 }
 0x10d   : > { %v1783_v4 = vpop.eup %1782  ;;  %1670 = vmatprep.mubr.bf16.mxu1 %v1781_v2  ;;  %1794 = vtanh.bf16 %v650_v11  ;;  %1705 = vmatpush3.bf16.msra.mxu0 %v1769_v6 }
 0x10e   : > { %1671 = vmatmul.mubr.bf16.gmra.mrb[24].mxu1 %v1783_v4  ;;  %v1785_v8 = vpop.eup %1784  ;;  %1796 = vtanh.bf16 %v649_v13  ;;  %1706 = vmatprep.subr.bf16.mxu0 %v1770_v25 }
 0x10f   : > { %1798 = vtanh.bf16 %v652_v12 }
 0x110   : > { %1800 = vtanh.bf16 %v651_v15 }
 0x111   : > { %1802 = vtanh.bf16 %v653_v19  ;;  %1707 = vmatpush3.bf16.msra.mxu0 %v1770_v25 }
 0x112   : > { %1708 = vmatprep.subr.bf16.mxu0 %v1771_v26 }
 0x114   : > { %v1787_v9 = vpop.eup %1786 }
 0x115   : > { %v1789_v10 = vpop.eup %1788  ;;  %1674 = vmatprep.mubr.bf16.mxu1 %v1787_v9  ;;  %1709 = vmatpush3.bf16.msra.mxu0 %v1771_v26 }
 0x116   : > { %1675 = vmatmul.mubr.bf16.gmra.mrb[28].mxu1 %v1789_v10  ;;  %v1791_v14 = vpop.eup %1790 }
 0x117   : > { %1678 = vmatprep.mubr.bf16.mxu1 %v1785_v8  ;;  %v1793_v16 = vpop.eup %1792 }
 0x118   : > { %v1795_v17 = vpop.eup %1794 }
 0x119   : > { %v1797_v18 = vpop.eup %1796 }
 0x11a   : > { %v1799_v20 = vpop.eup %1798 }
 0x11b   : > { %v1801_v21 = vpop.eup %1800 }
 0x11c   : > { %v1803_v22 = vpop.eup %1802 }
 0x11e   : > { %1679 = vmatmul.mubr.bf16.gmra.mrb[32].mxu1 %v1793_v16 }
 0x11f   : > { %1682 = vmatprep.mubr.bf16.mxu1 %v1791_v14 }
 0x126   : > { %1683 = vmatmul.mubr.bf16.gmra.mrb[36].mxu1 %v1797_v18 }
 0x127   : > { %1686 = vmatprep.mubr.bf16.mxu1 %v1795_v17 }
 0x12e   : > { %1687 = vmatmul.mubr.bf16.gmra.mrb[40].mxu1 %v1801_v21 }
 0x12f   : > { %1690 = vmatprep.mubr.bf16.mxu1 %v1799_v20 }
 0x136   : > { %1691 = vmatmul.mubr.bf16.gmra.mrb[44].mxu1 %v1803_v22 }
 0x1d1   : > { %v1664_v30 = vpop.f32.mrb[16].mxu1 }
 0x1d2   : > { %v768_v31 = vpop.f32.mrb[17].mxu1 }
 0x1d3   : > { %v1665_v33 = vpop.f32.mrb[18].mxu1 }
 0x1d4   : > { %v896_v34 = vpack.c.bf16 %v1665_v33, %v1664_v30  ;;  %v771_v35 = vpop.f32.mrb[19].mxu1 }
 0x1d5   : > { %v895_v36 = vpack.c.bf16 %v771_v35, %v768_v31 }
 0x1d6   : > { %v921_v37 = vadd.bf16 %v2089_v32, %v896_v34 }
 0x1d7   : > { %v920_v38 = vadd.bf16 %v2089_v32, %v895_v36 }
 0x1d9   : > { %1804 = vtanh.bf16 %v920_v38  ;;  %v1668_v39 = vpop.f32.mrb[20].mxu1 }
 0x1da   : > { %1806 = vtanh.bf16 %v921_v37  ;;  %v784_v40 = vpop.f32.mrb[21].mxu1 }
 0x1db   : > { %v1669_v41 = vpop.f32.mrb[22].mxu1 }
 0x1dc   : > { %v898_v42 = vpack.c.bf16 %v1669_v41, %v1668_v39  ;;  %v787_v43 = vpop.f32.mrb[23].mxu1 }
 0x1dd   : > { %v897_v44 = vpack.c.bf16 %v787_v43, %v784_v40 }
 0x1de   : > { %v923_v45 = vadd.bf16 %v2089_v32, %v898_v42 }
 0x1df   : > { %v922_v46 = vadd.bf16 %v2089_v32, %v897_v44 }
 0x1e1   : > { %1808 = vtanh.bf16 %v922_v46  ;;  %v1672_v47 = vpop.f32.mrb[24].mxu1 }
 0x1e2   : > { %1810 = vtanh.bf16 %v923_v45  ;;  %v800_v48 = vpop.f32.mrb[25].mxu1 }
 0x1e3   : > { %v1673_v49 = vpop.f32.mrb[26].mxu1 }
 0x1e4   : > { %v1805_v50 = vpop.eup %1804  ;;  %v900_v51 = vpack.c.bf16 %v1673_v49, %v1672_v47  ;;  %v803_v52 = vpop.f32.mrb[27].mxu1  ;;  %v1193_v49 = vld [vmem:[%s2280_s6] sm:$0x1] }
 0x1e5   : > { %v1807_v53 = vpop.eup %1806  ;;  %v899_v54 = vpack.c.bf16 %v803_v52, %v800_v48  ;;  %1710 = vmatprep.mubr.bf16.mxu0 %v1805_v50  ;;  %v1194_v50 = vpack.c.bf16 %v1193_v49, %v1193_v49 }
 0x1e6   : > { %v925_v55 = vadd.bf16 %v2089_v32, %v900_v51  ;;  %1711 = vmatmul.mubr.bf16.vlgmr.msra.gmra.mrb[16].mxu0 %v1807_v53 }
 0x1e7   : > { %v924_v56 = vadd.bf16 %v2089_v32, %v899_v54  ;;  %v1196_v51 = vpack.i.b16 %v1194_v50, %v1194_v50 }
 0x1e9   : > { %1812 = vtanh.bf16 %v924_v56  ;;  %v1676_v57 = vpop.f32.mrb[28].mxu1 }
 0x1ea   : > { %1814 = vtanh.bf16 %v925_v55  ;;  %v816_v58 = vpop.f32.mrb[29].mxu1 }
 0x1eb   : > { %v1677_v59 = vpop.f32.mrb[30].mxu1 }
 0x1ec   : > { %v1809_v60 = vpop.eup %1808  ;;  %v902_v61 = vpack.c.bf16 %v1677_v59, %v1676_v57  ;;  %v819_v62 = vpop.f32.mrb[31].mxu1 }
 0x1ed   : > { %v1811_v63 = vpop.eup %1810  ;;  %v901_v0 = vpack.c.bf16 %v819_v62, %v816_v58  ;;  %1714 = vmatprep.mubr.bf16.mxu0 %v1809_v60 }
 0x1ee   : > { %v927_v1 = vadd.bf16 %v2089_v32, %v902_v61  ;;  %1715 = vmatmul.mubr.bf16.gmra.mrb[20].mxu0 %v1811_v63 }
 0x1ef   : > { %v926_v2 = vadd.bf16 %v2089_v32, %v901_v0 }
 0x1f1   : > { %1816 = vtanh.bf16 %v926_v2  ;;  %v1680_v4 = vpop.f32.mrb[32].mxu1 }
 0x1f2   : > { %1818 = vtanh.bf16 %v927_v1  ;;  %v832_v5 = vpop.f32.mrb[33].mxu1 }
 0x1f3   : > { %v1681_v7 = vpop.f32.mrb[34].mxu1 }
 0x1f4   : > { %v1813_v8 = vpop.eup %1812  ;;  %v904_v9 = vpack.c.bf16 %v1681_v7, %v1680_v4  ;;  %v835_v10 = vpop.f32.mrb[35].mxu1 }
 0x1f5   : > { %v1815_v11 = vpop.eup %1814  ;;  %v903_v13 = vpack.c.bf16 %v835_v10, %v832_v5  ;;  %1718 = vmatprep.mubr.bf16.mxu0 %v1813_v8 }
 0x1f6   : > { %v929_v14 = vadd.bf16 %v2089_v32, %v904_v9  ;;  %1719 = vmatmul.mubr.bf16.gmra.mrb[24].mxu0 %v1815_v11  ;;  %v2120_v9 = vld [vmem:[%s2281_s7] ss:$0 sm:$0xff] }
 0x1f7   : > { %v928_v16 = vadd.bf16 %v2089_v32, %v903_v13 }
 0x1f9   : > { %1820 = vtanh.bf16 %v928_v16  ;;  %v1684_v12 = vpop.f32.mrb[36].mxu1 }
 0x1fa   : > { %1822 = vtanh.bf16 %v929_v14  ;;  %v848_v15 = vpop.f32.mrb[37].mxu1 }
 0x1fb   : > { %v1685_v17 = vpop.f32.mrb[38].mxu1 }
 0x1fc   : > { %v1817_v18 = vpop.eup %1816  ;;  %v906_v19 = vpack.c.bf16 %v1685_v17, %v1684_v12  ;;  %v851_v20 = vpop.f32.mrb[39].mxu1 }
 0x1fd   : > { %v1819_v21 = vpop.eup %1818  ;;  %v905_v22 = vpack.c.bf16 %v851_v20, %v848_v15  ;;  %1722 = vmatprep.mubr.bf16.mxu0 %v1817_v18 }
 0x1fe   : > { %v931_v23 = vadd.bf16 %v2089_v32, %v906_v19  ;;  %1723 = vmatmul.mubr.bf16.gmra.mrb[28].mxu0 %v1819_v21 }
 0x1ff   : > { %v930_v24 = vadd.bf16 %v2089_v32, %v905_v22 }
 0x201   : > { %1824 = vtanh.bf16 %v930_v24  ;;  %v1688_v6 = vpop.f32.mrb[40].mxu1 }
 0x202   : > { %1826 = vtanh.bf16 %v931_v23  ;;  %v864_v25 = vpop.f32.mrb[41].mxu1 }
 0x203   : > { %v1689_v26 = vpop.f32.mrb[42].mxu1 }
 0x204   : > { %v1821_v27 = vpop.eup %1820  ;;  %v908_v28 = vpack.c.bf16 %v1689_v26, %v1688_v6  ;;  %v867_v29 = vpop.f32.mrb[43].mxu1 }
 0x205   : > { %v1823_v30 = vpop.eup %1822  ;;  %v907_v31 = vpack.c.bf16 %v867_v29, %v864_v25  ;;  %1726 = vmatprep.mubr.bf16.mxu0 %v1821_v27 }
 0x206   : > { %v933_v33 = vadd.bf16 %v2089_v32, %v908_v28  ;;  %1727 = vmatmul.mubr.bf16.gmra.mrb[32].mxu0 %v1823_v30 }
 0x207   : > { %v932_v34 = vadd.bf16 %v2089_v32, %v907_v31 }
 0x209   : > { %1828 = vtanh.bf16 %v932_v34  ;;  %v1692_v35 = vpop.f32.mrb[44].mxu1 }
 0x20a   : > { %1830 = vtanh.bf16 %v933_v33  ;;  %v880_v36 = vpop.f32.mrb[45].mxu1 }
 0x20b   : > { %v1693_v37 = vpop.f32.mrb[46].mxu1 }
 0x20c   : > { %v1825_v38 = vpop.eup %1824  ;;  %v910_v39 = vpack.c.bf16 %v1693_v37, %v1692_v35  ;;  %v883_v40 = vpop.f32.mrb[47].mxu1 }
 0x20d   : > { %v1827_v41 = vpop.eup %1826  ;;  %v909_v42 = vpack.c.bf16 %v883_v40, %v880_v36  ;;  %1730 = vmatprep.mubr.bf16.mxu0 %v1825_v38 }
 0x20e   : > { %v935_v43 = vadd.bf16 %v2089_v32, %v910_v39  ;;  %1731 = vmatmul.mubr.bf16.gmra.mrb[36].mxu0 %v1827_v41 }
 0x20f   : > { %v934_v44 = vadd.bf16 %v2089_v32, %v909_v42  ;;  %v2111_v32 = vrot.slane %v1196_v51, %v2037_v3 }
 0x211   : > { %1832 = vtanh.bf16 %v934_v44 }
 0x212   : > { %1834 = vtanh.bf16 %v935_v43 }
 0x214   : > { %v1829_v45 = vpop.eup %1828 }
 0x215   : > { %v1831_v46 = vpop.eup %1830  ;;  %1734 = vmatprep.mubr.bf16.mxu0 %v1829_v45 }
 0x216   : > { %1735 = vmatmul.mubr.bf16.gmra.mrb[40].mxu0 %v1831_v46 }
 0x21c   : > { %v1833_v47 = vpop.eup %1832 }
 0x21d   : > { %v1835_v48 = vpop.eup %1834  ;;  %1738 = vmatprep.mubr.bf16.mxu0 %v1833_v47 }
 0x21e   : > { %1739 = vmatmul.mubr.bf16.gmra.mrb[44].mxu0 %v1835_v48 }
 0x2b9   : > { %v1712_v52 = vpop.f32.mrb[16].mxu0 }
 0x2ba   : > { %v1050_v53 = vpop.f32.mrb[17].mxu0 }
 0x2bb   : > { %v1713_v54 = vpop.f32.mrb[18].mxu0 }
 0x2bc   : > { %v1178_v55 = vpack.c.bf16 %v1713_v54, %v1712_v52  ;;  %v1053_v56 = vpop.f32.mrb[19].mxu0 }
 0x2bd   : > { %v1177_v57 = vpack.c.bf16 %v1053_v56, %v1050_v53 }
 0x2be   : > { %v1203_v58 = vadd.bf16 %v2111_v32, %v1178_v55 }
 0x2bf   : > { %v1202_v59 = vadd.bf16 %v2111_v32, %v1177_v57 }
 0x2c0   : > { %1836 = vtanh.bf16 %v1203_v58 }
 0x2c1   : > { %1838 = vtanh.bf16 %v1202_v59  ;;  %v1716_v60 = vpop.f32.mrb[20].mxu0 }
 0x2c2   : > { %v1066_v61 = vpop.f32.mrb[21].mxu0 }
 0x2c3   : > { %v1717_v62 = vpop.f32.mrb[22].mxu0 }
 0x2c4   : > { %v1180_v63 = vpack.c.bf16 %v1717_v62, %v1716_v60  ;;  %v1069_v0 = vpop.f32.mrb[23].mxu0 }
 0x2c5   : > { %v1179_v1 = vpack.c.bf16 %v1069_v0, %v1066_v61 }
 0x2c6   : > { %v1205_v2 = vadd.bf16 %v2111_v32, %v1180_v63 }
 0x2c7   : > { %v1204_v3 = vadd.bf16 %v2111_v32, %v1179_v1 }
 0x2c8   : > { %1840 = vtanh.bf16 %v1205_v2 }
 0x2c9   : > { %1842 = vtanh.bf16 %v1204_v3  ;;  %v1720_v4 = vpop.f32.mrb[24].mxu0 }
 0x2ca   : > { %v1082_v5 = vpop.f32.mrb[25].mxu0 }
 0x2cb   : > { %v1837_v7 = vpop.eup %1836  ;;  %v1721_v8 = vpop.f32.mrb[26].mxu0 }
 0x2cc   : > { %v1839_v10 = vpop.eup %1838  ;;  %v1182_v11 = vpack.c.bf16 %v1721_v8, %v1720_v4  ;;  %v1085_v13 = vpop.f32.mrb[27].mxu0  ;;  %v1236_v14 = vunpack.c.l.bf16 %v1837_v7  ;;  %v1237_v18 = vunpack.c.h.bf16 %v1837_v7 }
 0x2cd   : > { %v1181_v16 = vpack.c.bf16 %v1085_v13, %v1082_v5  ;;  %v1234_v12 = vunpack.c.l.bf16 %v1839_v10  ;;  %v1235_v21 = vunpack.c.h.bf16 %v1839_v10 }
 0x2ce   : > { %v1207_v15 = vadd.bf16 %v2111_v32, %v1182_v11  ;;  %v1275_v17 = vmul.f32 %v2120_v9, %v1236_v14  ;;  %v1276_v24 = vmul.f32 %v2120_v9, %v1237_v18 }
 0x2cf   : > { %v1206_v19 = vadd.bf16 %v2111_v32, %v1181_v16  ;;  %v1273_v20 = vmul.f32 %v2120_v9, %v1234_v12  ;;  %v1274_v26 = vmul.f32 %v2120_v9, %v1235_v21 }
 0x2d0   : > { %1844 = vtanh.bf16 %v1207_v15  ;;  %1309 = vadd.xlane.f32.xlu1 %v1275_v17 }
 0x2d1   : > { %1846 = vtanh.bf16 %v1206_v19  ;;  %1305 = vadd.xlane.f32.xlu0 %v1273_v20  ;;  %v1724_v22 = vpop.f32.mrb[28].mxu0 }
 0x2d2   : > { %v1098_v23 = vpop.f32.mrb[29].mxu0 }
 0x2d3   : > { %v1841_v6 = vpop.eup %1840  ;;  %v1725_v25 = vpop.f32.mrb[30].mxu0 }
 0x2d4   : > { %v1843_v27 = vpop.eup %1842  ;;  %v1184_v28 = vpack.c.bf16 %v1725_v25, %v1724_v22  ;;  %1311 = vadd.xlane.f32.xlu1 %v1276_v24  ;;  %v1101_v29 = vpop.f32.mrb[31].mxu0  ;;  %v1241_v30 = vunpack.c.h.bf16 %v1841_v6  ;;  %v1240_v31 = vunpack.c.l.bf16 %v1841_v6 }
 0x2d5   : > { %v1183_v33 = vpack.c.bf16 %v1101_v29, %v1098_v23  ;;  %1307 = vadd.xlane.f32.xlu0 %v1274_v26  ;;  %v1239_v37 = vunpack.c.h.bf16 %v1843_v27  ;;  %v1238_v39 = vunpack.c.l.bf16 %v1843_v27 }
 0x2d6   : > { %v1209_v34 = vadd.bf16 %v2111_v32, %v1184_v28  ;;  %v1280_v35 = vmul.f32 %v2120_v9, %v1241_v30  ;;  %v1279_v36 = vmul.f32 %v2120_v9, %v1240_v31 }
 0x2d7   : > { %v1208_v38 = vadd.bf16 %v2111_v32, %v1183_v33  ;;  %v1278_v42 = vmul.f32 %v2120_v9, %v1239_v37  ;;  %v1277_v45 = vmul.f32 %v2120_v9, %v1238_v39 }
 0x2d8   : > { %1848 = vtanh.bf16 %v1209_v34  ;;  %1319 = vadd.xlane.f32.xlu1 %v1280_v35 }
 0x2d9   : > { %1850 = vtanh.bf16 %v1208_v38  ;;  %1317 = vadd.xlane.f32.xlu0 %v1279_v36  ;;  %v1728_v40 = vpop.f32.mrb[32].mxu0 }
 0x2da   : > { %v1114_v41 = vpop.f32.mrb[33].mxu0 }
 0x2db   : > { %v1845_v43 = vpop.eup %1844  ;;  %v1729_v44 = vpop.f32.mrb[34].mxu0 }
 0x2dc   : > { %v1847_v46 = vpop.eup %1846  ;;  %v1186_v47 = vpack.c.bf16 %v1729_v44, %v1728_v40  ;;  %1315 = vadd.xlane.f32.xlu1 %v1278_v42  ;;  %v1117_v48 = vpop.f32.mrb[35].mxu0  ;;  %v1245_v49 = vunpack.c.h.bf16 %v1845_v43  ;;  %v1244_v50 = vunpack.c.l.bf16 %v1845_v43 }
 0x2dd   : > { %v1185_v51 = vpack.c.bf16 %v1117_v48, %v1114_v41  ;;  %1313 = vadd.xlane.f32.xlu0 %v1277_v45  ;;  %v1243_v55 = vunpack.c.h.bf16 %v1847_v46  ;;  %v1242_v57 = vunpack.c.l.bf16 %v1847_v46 }
 0x2de   : > { %v1211_v52 = vadd.bf16 %v2111_v32, %v1186_v47  ;;  %v1284_v53 = vmul.f32 %v2120_v9, %v1245_v49  ;;  %v1283_v54 = vmul.f32 %v2120_v9, %v1244_v50 }
 0x2df   : > { %v1210_v56 = vadd.bf16 %v2111_v32, %v1185_v51  ;;  %v1282_v60 = vmul.f32 %v2120_v9, %v1243_v55  ;;  %v1281_v63 = vmul.f32 %v2120_v9, %v1242_v57 }
 0x2e0   : > { %1852 = vtanh.bf16 %v1211_v52  ;;  %1327 = vadd.xlane.f32.xlu1 %v1284_v53 }
 0x2e1   : > { %1854 = vtanh.bf16 %v1210_v56  ;;  %1325 = vadd.xlane.f32.xlu0 %v1283_v54  ;;  %v1732_v58 = vpop.f32.mrb[36].mxu0 }
 0x2e2   : > { %v1130_v59 = vpop.f32.mrb[37].mxu0 }
 0x2e3   : > { %v1849_v61 = vpop.eup %1848  ;;  %v1733_v62 = vpop.f32.mrb[38].mxu0 }
 0x2e4   : > { %v1851_v0 = vpop.eup %1850  ;;  %v1188_v1 = vpack.c.bf16 %v1733_v62, %v1732_v58  ;;  %1323 = vadd.xlane.f32.xlu1 %v1282_v60  ;;  %v1133_v2 = vpop.f32.mrb[39].mxu0  ;;  %v1249_v3 = vunpack.c.h.bf16 %v1849_v61  ;;  %v1248_v4 = vunpack.c.l.bf16 %v1849_v61 }
 0x2e5   : > { %v1187_v5 = vpack.c.bf16 %v1133_v2, %v1130_v59  ;;  %1321 = vadd.xlane.f32.xlu0 %v1281_v63  ;;  %v1247_v11 = vunpack.c.h.bf16 %v1851_v0  ;;  %v1246_v14 = vunpack.c.l.bf16 %v1851_v0 }
 0x2e6   : > { %v1213_v7 = vadd.bf16 %v2111_v32, %v1188_v1  ;;  %v1288_v8 = vmul.f32 %v2120_v9, %v1249_v3  ;;  %v1287_v10 = vmul.f32 %v2120_v9, %v1248_v4 }
 0x2e7   : > { %v1212_v13 = vadd.bf16 %v2111_v32, %v1187_v5  ;;  %v1286_v15 = vmul.f32 %v2120_v9, %v1247_v11  ;;  %v1285_v19 = vmul.f32 %v2120_v9, %v1246_v14 }
 0x2e8   : > { %1856 = vtanh.bf16 %v1213_v7  ;;  %1335 = vadd.xlane.f32.xlu1 %v1288_v8  ;;  %v2166_v8 = vld [vmem:[#allocation2] ss:$0 sm:$0xff] }
 0x2e9   : > { %1858 = vtanh.bf16 %v1212_v13  ;;  %1333 = vadd.xlane.f32.xlu0 %v1287_v10  ;;  %v1736_v16 = vpop.f32.mrb[40].mxu0 }
 0x2ea   : > { %v1146_v12 = vpop.f32.mrb[41].mxu0 }
 0x2eb   : > { %v1853_v17 = vpop.eup %1852  ;;  %v1737_v18 = vpop.f32.mrb[42].mxu0 }
 0x2ec   : > { %v1855_v20 = vpop.eup %1854  ;;  %v1190_v21 = vpack.c.bf16 %v1737_v18, %v1736_v16  ;;  %1331 = vadd.xlane.f32.xlu1 %v1286_v15  ;;  %v1149_v22 = vpop.f32.mrb[43].mxu0  ;;  %v1253_v23 = vunpack.c.h.bf16 %v1853_v17  ;;  %v1252_v24 = vunpack.c.l.bf16 %v1853_v17 }
 0x2ed   : > { %v1189_v6 = vpack.c.bf16 %v1149_v22, %v1146_v12  ;;  %1329 = vadd.xlane.f32.xlu0 %v1285_v19  ;;  %v1251_v28 = vunpack.c.h.bf16 %v1855_v20  ;;  %v1250_v30 = vunpack.c.l.bf16 %v1855_v20 }
 0x2ee   : > { %v1215_v25 = vadd.bf16 %v2111_v32, %v1190_v21  ;;  %v1292_v26 = vmul.f32 %v2120_v9, %v1253_v23  ;;  %v1291_v27 = vmul.f32 %v2120_v9, %v1252_v24 }
 0x2ef   : > { %v1214_v29 = vadd.bf16 %v2111_v32, %v1189_v6  ;;  %v1290_v34 = vmul.f32 %v2120_v9, %v1251_v28  ;;  %v1289_v37 = vmul.f32 %v2120_v9, %v1250_v30 }
 0x2f0   : > { %1860 = vtanh.bf16 %v1215_v25  ;;  %1343 = vadd.xlane.f32.xlu1 %v1292_v26 }
 0x2f1   : > { %1862 = vtanh.bf16 %v1214_v29  ;;  %1341 = vadd.xlane.f32.xlu0 %v1291_v27  ;;  %v1740_v31 = vpop.f32.mrb[44].mxu0 }
 0x2f2   : > { %v1162_v33 = vpop.f32.mrb[45].mxu0 }
 0x2f3   : > { %v1857_v35 = vpop.eup %1856  ;;  %v1741_v36 = vpop.f32.mrb[46].mxu0 }
 0x2f4   : > { %v1859_v38 = vpop.eup %1858  ;;  %v1192_v39 = vpack.c.bf16 %v1741_v36, %v1740_v31  ;;  %1339 = vadd.xlane.f32.xlu1 %v1290_v34  ;;  %v1165_v40 = vpop.f32.mrb[47].mxu0  ;;  %v1257_v41 = vunpack.c.h.bf16 %v1857_v35  ;;  %v1256_v42 = vunpack.c.l.bf16 %v1857_v35 }
 0x2f5   : > { %v1191_v43 = vpack.c.bf16 %v1165_v40, %v1162_v33  ;;  %1337 = vadd.xlane.f32.xlu0 %v1289_v37  ;;  %v1255_v47 = vunpack.c.h.bf16 %v1859_v38  ;;  %v1254_v49 = vunpack.c.l.bf16 %v1859_v38 }
 0x2f6   : > { %v1217_v44 = vadd.bf16 %v2111_v32, %v1192_v39  ;;  %v1296_v45 = vmul.f32 %v2120_v9, %v1257_v41  ;;  %v1295_v46 = vmul.f32 %v2120_v9, %v1256_v42 }
 0x2f7   : > { %v1216_v48 = vadd.bf16 %v2111_v32, %v1191_v43  ;;  %v1294_v50 = vmul.f32 %v2120_v9, %v1255_v47  ;;  %v1293_v52 = vmul.f32 %v2120_v9, %v1254_v49 }
 0x2f8   : > { %1864 = vtanh.bf16 %v1217_v44  ;;  %1351 = vadd.xlane.f32.xlu1 %v1296_v45 }
 0x2f9   : > { %1866 = vtanh.bf16 %v1216_v48  ;;  %1349 = vadd.xlane.f32.xlu0 %v1295_v46 }
 0x2fb   : > { %v1861_v51 = vpop.eup %1860 }
 0x2fc   : > { %v1863_v53 = vpop.eup %1862  ;;  %1347 = vadd.xlane.f32.xlu1 %v1294_v50  ;;  %v1261_v54 = vunpack.c.h.bf16 %v1861_v51  ;;  %v1260_v55 = vunpack.c.l.bf16 %v1861_v51 }
 0x2fd   : > { %1345 = vadd.xlane.f32.xlu0 %v1293_v52  ;;  %v1259_v32 = vunpack.c.h.bf16 %v1863_v53  ;;  %v1258_v58 = vunpack.c.l.bf16 %v1863_v53 }
 0x2fe   : > { %v1300_v56 = vmul.f32 %v2120_v9, %v1261_v54  ;;  %v1299_v57 = vmul.f32 %v2120_v9, %v1260_v55 }
 0x2ff   : > { %v1298_v59 = vmul.f32 %v2120_v9, %v1259_v32  ;;  %v1297_v61 = vmul.f32 %v2120_v9, %v1258_v58 }
 0x300   : > { %1359 = vadd.xlane.f32.xlu1 %v1300_v56 }
 0x301   : > { %1357 = vadd.xlane.f32.xlu0 %v1299_v57 }
 0x303   : > { %v1865_v60 = vpop.eup %1864 }
 0x304   : > { %v1867_v62 = vpop.eup %1866  ;;  %1355 = vadd.xlane.f32.xlu1 %v1298_v59  ;;  %v1265_v3 = vunpack.c.h.bf16 %v1865_v60  ;;  %v1264_v4 = vunpack.c.l.bf16 %v1865_v60 }
 0x305   : > { %1353 = vadd.xlane.f32.xlu0 %v1297_v61  ;;  %v1263_v63 = vunpack.c.h.bf16 %v1867_v62  ;;  %v1262_v0 = vunpack.c.l.bf16 %v1867_v62 }
 0x306   : > { %v1304_v5 = vmul.f32 %v2120_v9, %v1265_v3  ;;  %v1303_v7 = vmul.f32 %v2120_v9, %v1264_v4 }
 0x307   : > { %v1302_v1 = vmul.f32 %v2120_v9, %v1263_v63  ;;  %v1301_v2 = vmul.f32 %v2120_v9, %v1262_v0 }
 0x309   : > { %1363 = vadd.xlane.f32.xlu1 %v1302_v1  ;;  %1361 = vadd.xlane.f32.xlu0 %v1301_v2 }
 0x30d   : > { %1367 = vadd.xlane.f32.xlu1 %v1304_v5  ;;  %1365 = vadd.xlane.f32.xlu0 %v1303_v7 }
 0x35d   : > { %v1310_v10 = vpop.xlane.xlu1 %1309 }
 0x35e   : > { %v1378_v11 = vadd.f32 %v2166_v8, %v1310_v10  ;;  %v1306_v9 = vpop.xlane.xlu0 %1305 }
 0x35f   : > { %v1376_v13 = vadd.f32 %v2166_v8, %v1306_v9 }
 0x360   : > { %1411 = vst.msk [vmem:[%s2173_s25 + $0x10] sm:$0xff] %vm1408_vm1, %v1378_v11 }
 0x361   : > { %1409 = vst.msk [vmem:[%s2173_s25] sm:$0xff] %vm1408_vm1, %v1376_v13  ;;  %v1312_v14 = vpop.xlane.xlu1 %1311 }
 0x362   : > { %v1379_v16 = vadd.f32 %v2166_v8, %v1312_v14  ;;  %v1308_v12 = vpop.xlane.xlu0 %1307 }
 0x363   : > { %v1377_v15 = vadd.f32 %v2166_v8, %v1308_v12 }
 0x364   : > { %1412 = vst.msk [vmem:[%s2173_s25 + $0x18] sm:$0xff] %vm1408_vm1, %v1379_v16 }
 0x365   : > { %1410 = vst.msk [vmem:[%s2173_s25 + $0x8] sm:$0xff] %vm1408_vm1, %v1377_v15  ;;  %v1320_v17 = vpop.xlane.xlu1 %1319 }
 0x366   : > { %v1383_v18 = vadd.f32 %v2166_v8, %v1320_v17  ;;  %v1318_v19 = vpop.xlane.xlu0 %1317 }
 0x367   : > { %v1382_v20 = vadd.f32 %v2166_v8, %v1318_v19 }
 0x368   : > { %1416 = vst.msk [vmem:[%s2173_s25 + $0x38] sm:$0xff] %vm1408_vm1, %v1383_v18 }
 0x369   : > { %1415 = vst.msk [vmem:[%s2173_s25 + $0x30] sm:$0xff] %vm1408_vm1, %v1382_v20  ;;  %v1316_v21 = vpop.xlane.xlu1 %1315 }
 0x36a   : > { %v1381_v22 = vadd.f32 %v2166_v8, %v1316_v21  ;;  %v1314_v23 = vpop.xlane.xlu0 %1313 }
 0x36b   : > { %v1380_v24 = vadd.f32 %v2166_v8, %v1314_v23 }
 0x36c   : > { %1414 = vst.msk [vmem:[%s2173_s25 + $0x28] sm:$0xff] %vm1408_vm1, %v1381_v22 }
 0x36d   : > { %1413 = vst.msk [vmem:[%s2173_s25 + $0x20] sm:$0xff] %vm1408_vm1, %v1380_v24  ;;  %v1328_v6 = vpop.xlane.xlu1 %1327 }
 0x36e   : > { %v1387_v25 = vadd.f32 %v2166_v8, %v1328_v6  ;;  %v1326_v26 = vpop.xlane.xlu0 %1325 }
 0x36f   : > { %v1386_v27 = vadd.f32 %v2166_v8, %v1326_v26 }
 0x370   : > { %1420 = vst.msk [vmem:[%s2173_s25 + $0x58] sm:$0xff] %vm1408_vm1, %v1387_v25 }
 0x371   : > { %1419 = vst.msk [vmem:[%s2173_s25 + $0x50] sm:$0xff] %vm1408_vm1, %v1386_v27  ;;  %v1324_v28 = vpop.xlane.xlu1 %1323 }
 0x372   : > { %v1385_v29 = vadd.f32 %v2166_v8, %v1324_v28  ;;  %v1322_v30 = vpop.xlane.xlu0 %1321 }
 0x373   : > { %v1384_v31 = vadd.f32 %v2166_v8, %v1322_v30 }
 0x374   : > { %1418 = vst.msk [vmem:[%s2173_s25 + $0x48] sm:$0xff] %vm1408_vm1, %v1385_v29 }
 0x375   : > { %1417 = vst.msk [vmem:[%s2173_s25 + $0x40] sm:$0xff] %vm1408_vm1, %v1384_v31  ;;  %v1336_v33 = vpop.xlane.xlu1 %1335 }
 0x376   : > { %v1391_v34 = vadd.f32 %v2166_v8, %v1336_v33  ;;  %v1334_v35 = vpop.xlane.xlu0 %1333 }
 0x377   : > { %v1390_v36 = vadd.f32 %v2166_v8, %v1334_v35 }
 0x378   : > { %1424 = vst.msk [vmem:[%s2173_s25 + $0x78] sm:$0xff] %vm1408_vm1, %v1391_v34 }
 0x379   : > { %1423 = vst.msk [vmem:[%s2173_s25 + $0x70] sm:$0xff] %vm1408_vm1, %v1390_v36  ;;  %v1332_v37 = vpop.xlane.xlu1 %1331 }
 0x37a   : > { %v1389_v38 = vadd.f32 %v2166_v8, %v1332_v37  ;;  %v1330_v39 = vpop.xlane.xlu0 %1329 }
 0x37b   : > { %v1388_v40 = vadd.f32 %v2166_v8, %v1330_v39 }
 0x37c   : > { %1422 = vst.msk [vmem:[%s2173_s25 + $0x68] sm:$0xff] %vm1408_vm1, %v1389_v38 }
 0x37d   : > { %1421 = vst.msk [vmem:[%s2173_s25 + $0x60] sm:$0xff] %vm1408_vm1, %v1388_v40  ;;  %v1344_v41 = vpop.xlane.xlu1 %1343 }
 0x37e   : > { %v1395_v42 = vadd.f32 %v2166_v8, %v1344_v41  ;;  %v1342_v43 = vpop.xlane.xlu0 %1341 }
 0x37f   : > { %v1394_v44 = vadd.f32 %v2166_v8, %v1342_v43 }
 0x380   : > { %1428 = vst.msk [vmem:[%s2173_s25 + $0x98] sm:$0xff] %vm1408_vm1, %v1395_v42 }
 0x381   : > { %1427 = vst.msk [vmem:[%s2173_s25 + $0x90] sm:$0xff] %vm1408_vm1, %v1394_v44  ;;  %v1340_v45 = vpop.xlane.xlu1 %1339 }
 0x382   : > { %v1393_v46 = vadd.f32 %v2166_v8, %v1340_v45  ;;  %v1338_v47 = vpop.xlane.xlu0 %1337 }
 0x383   : > { %v1392_v48 = vadd.f32 %v2166_v8, %v1338_v47 }
 0x384   : > { %1426 = vst.msk [vmem:[%s2173_s25 + $0x88] sm:$0xff] %vm1408_vm1, %v1393_v46 }
 0x385   : > { %1425 = vst.msk [vmem:[%s2173_s25 + $0x80] sm:$0xff] %vm1408_vm1, %v1392_v48  ;;  %v1352_v49 = vpop.xlane.xlu1 %1351 }
 0x386   : > { %v1399_v50 = vadd.f32 %v2166_v8, %v1352_v49  ;;  %v1350_v51 = vpop.xlane.xlu0 %1349 }
 0x387   : > { %v1398_v52 = vadd.f32 %v2166_v8, %v1350_v51 }
 0x388   : > { %1432 = vst.msk [vmem:[%s2173_s25 + $0xb8] sm:$0xff] %vm1408_vm1, %v1399_v50 }
 0x389   : > { %1431 = vst.msk [vmem:[%s2173_s25 + $0xb0] sm:$0xff] %vm1408_vm1, %v1398_v52  ;;  %v1348_v53 = vpop.xlane.xlu1 %1347 }
 0x38a   : > { %v1397_v54 = vadd.f32 %v2166_v8, %v1348_v53  ;;  %v1346_v55 = vpop.xlane.xlu0 %1345 }
 0x38b   : > { %v1396_v56 = vadd.f32 %v2166_v8, %v1346_v55 }
 0x38c   : > { %1430 = vst.msk [vmem:[%s2173_s25 + $0xa8] sm:$0xff] %vm1408_vm1, %v1397_v54 }
 0x38d   : > { %1429 = vst.msk [vmem:[%s2173_s25 + $0xa0] sm:$0xff] %vm1408_vm1, %v1396_v56  ;;  %v1360_v57 = vpop.xlane.xlu1 %1359 }
 0x38e   : > { %v1403_v32 = vadd.f32 %v2166_v8, %v1360_v57  ;;  %v1358_v58 = vpop.xlane.xlu0 %1357 }
 0x38f   : > { %v1402_v59 = vadd.f32 %v2166_v8, %v1358_v58 }
 0x390   : > { %1436 = vst.msk [vmem:[%s2173_s25 + $0xd8] sm:$0xff] %vm1408_vm1, %v1403_v32 }
 0x391   : > { %1435 = vst.msk [vmem:[%s2173_s25 + $0xd0] sm:$0xff] %vm1408_vm1, %v1402_v59  ;;  %v1356_v60 = vpop.xlane.xlu1 %1355 }
 0x392   : > { %v1401_v61 = vadd.f32 %v2166_v8, %v1356_v60  ;;  %v1354_v62 = vpop.xlane.xlu0 %1353 }
 0x393   : > { %v1400_v63 = vadd.f32 %v2166_v8, %v1354_v62 }
 0x394   : > { %1434 = vst.msk [vmem:[%s2173_s25 + $0xc8] sm:$0xff] %vm1408_vm1, %v1401_v61 }
 0x395   : > { %1433 = vst.msk [vmem:[%s2173_s25 + $0xc0] sm:$0xff] %vm1408_vm1, %v1400_v63 }
 0x396   : > { %v1364_v0 = vpop.xlane.xlu1 %1363  ;;  %v1362_v1 = vpop.xlane.xlu0 %1361 }
 0x397   : > { %v1405_v2 = vadd.f32 %v2166_v8, %v1364_v0  ;;  %v1404_v3 = vadd.f32 %v2166_v8, %v1362_v1 }
 0x399   : > { %1438 = vst.msk [vmem:[%s2173_s25 + $0xe8] sm:$0xff] %vm1408_vm1, %v1405_v2  ;;  %1437 = vst.msk [vmem:[%s2173_s25 + $0xe0] sm:$0xff] %vm1408_vm1, %v1404_v3 }
 0x39a   : > { %v1368_v4 = vpop.xlane.xlu1 %1367  ;;  %v1366_v5 = vpop.xlane.xlu0 %1365 }
 0x39b   : > { %v1407_v7 = vadd.f32 %v2166_v8, %v1368_v4  ;;  %v1406_v10 = vadd.f32 %v2166_v8, %v1366_v5 }
 0x39d   : > { %1440 = vst.msk [vmem:[%s2173_s25 + $0xf8] sm:$0xff] %vm1408_vm1, %v1407_v7  ;;  %1439 = vst.msk [vmem:[%s2173_s25 + $0xf0] sm:$0xff] %vm1408_vm1, %v1406_v10 }
 0x39e PF: > { %s21_s11 = sadd.s32 1, %s1874_s11  }
 0x39f   : > { %p18_p4 = scmp.ge.s32.totalorder %s21_s11, 4  }
 0x3a1   :  { %20 = sbr.rel (!%p18_p4) target bundleno = 3 (0x3), region = 86 }

</bundles_post_ra>
